<compile_context>
chip_gen: v7x
topology: tpu7x:2x2x1
jax: 0.10.0
libtpu: 0.0.40
codegen_flags: <defaults>
</compile_context>

<pallas_src>
import functools

import jax
import jax.numpy as jnp
from jax import lax
from jax.experimental import pallas as pl
from jax.experimental.pallas import tpu as pltpu


def _basic_block_kernel(x_ref, w1_ref, b1_ref, w2_ref, b2_ref, o_ref, *,
                        length, c_out):
    # x_ref: (Cin, batch_tile * length) slab, channels on sublanes, length on
    # lanes (lane-dense).
    x = x_ref[...].astype(jnp.float32)                     # (Cin, lanes)
    lanes = x.shape[1]

    # Per-sample column index (the lane axis packs batch_tile samples of
    # `length` columns each). Used to zero conv taps that would otherwise
    # leak across sample boundaries / the padding=1 edges after the roll.
    col = lax.broadcasted_iota(jnp.int32, (c_out, lanes), 1) % length
    is_first = col == 0
    is_last = col == (length - 1)

    def conv3(h, w_stack):
        # w_stack: (3*Cout, Cin), taps stacked tap-major along rows.
        # y_t[d, m] = sum_c w[d, c, t] * h[c, m]
        y = jnp.dot(w_stack, h, preferred_element_type=jnp.float32)
        y0 = y[:c_out]              # tap t=0: pairs with input column l-1
        y1 = y[c_out:2 * c_out]     # tap t=1: pairs with input column l
        y2 = y[2 * c_out:]          # tap t=2: pairs with input column l+1
        # out[:, l] = y0[:, l-1] + y1[:, l] + y2[:, l+1]   (zeros at edges)
        left = jnp.where(is_first, 0.0, pltpu.roll(y0, 1, 1))
        right = jnp.where(is_last, 0.0, pltpu.roll(y2, lanes - 1, 1))
        return left + y1 + right

    # conv1 (BN1 scale folded into w1) -> +bias -> ReLU
    h = conv3(x, w1_ref[...]) + b1_ref[...]
    h = jnp.maximum(h, 0.0)
    # conv2 (BN2 scale folded into w2) -> +bias -> residual -> ReLU
    h = conv3(h, w2_ref[...]) + b2_ref[...]
    h = jnp.maximum(h + x, 0.0)

    o_ref[...] = h.astype(o_ref.dtype)


def _fold_bn(conv_w, gamma, beta, mean, var, *, eps):
    """Fold inference-mode BN into the conv weight.

    conv_w: (Cout, Cin, 3) PyTorch Conv1d layout.
    Returns tap-stacked weight (3*Cout, Cin) and per-channel bias (Cout, 1).
    """
    scale = gamma * lax.rsqrt(var + eps)
    bias = beta - mean * scale
    w = conv_w * scale[:, None, None]
    c_out, c_in, k = w.shape
    w_stack = jnp.transpose(w, (2, 0, 1)).reshape(k * c_out, c_in)
    return w_stack.astype(jnp.float32), bias.reshape(c_out, 1).astype(jnp.float32)


def _pick_batch_tile(n, length):
    # Aim for ~2K lane columns per grid step (amortize ~0.35us/step overhead,
    # bound per-step VMEM), while keeping the block lane dim 128-aligned.
    target_cols = 2048
    bt = max(1, min(n, target_cols // max(length, 1)))
    while n % bt:
        bt -= 1
    if bt < n and (bt * length) % 128 != 0:
        bt = n  # fall back to a single step (block == full array is always legal)
    return bt


def basic_block_1d(x, conv1_w, bn1, conv2_w, bn2, *, eps=1e-5, batch_tile=None):
    """Inference-mode BasicBlock1D forward.

    x: (N, C, L) float.  conv*_w: (C, C, 3) PyTorch Conv1d weights (bias=False).
    bn* = (gamma, beta, running_mean, running_var) each of shape (C,).
    """
    n, c_in, length = x.shape
    c_out = conv1_w.shape[0]
    assert c_in == c_out, "residual add requires inplanes == planes (downsample=None)"
    assert conv2_w.shape == (c_out, c_out, 3)

    w1s, b1 = _fold_bn(conv1_w, *bn1, eps=eps)
    w2s, b2 = _fold_bn(conv2_w, *bn2, eps=eps)

    if batch_tile is None:
        batch_tile = _pick_batch_tile(n, length)
    assert n % batch_tile == 0
    assert batch_tile == n or (batch_tile * length) % 128 == 0

    cols = batch_tile * length
    # channels-on-sublanes, (batch*length)-on-lanes slab
    x_slab = jnp.transpose(x, (1, 0, 2)).reshape(c_in, n * length)

    grid = (n // batch_tile,)
    # per-step f32 footprint: in block + out block + (3*Cout, cols) intermediate
    block_bytes = (c_in + c_out + 3 * c_out) * cols * 4
    vmem_limit = int(min(64 * 1024 * 1024, max(32 * 1024 * 1024, 6 * block_bytes)))

    kernel = functools.partial(_basic_block_kernel, length=length, c_out=c_out)

    out_slab = pl.pallas_call(
        kernel,
        out_shape=jax.ShapeDtypeStruct((c_out, n * length), x.dtype),
        grid_spec=pltpu.PrefetchScalarGridSpec(
            num_scalar_prefetch=0,
            grid=grid,
            in_specs=[
                pl.BlockSpec((c_in, cols), lambda i: (0, i)),         # x slab
                pl.BlockSpec((3 * c_out, c_in), lambda i: (0, 0)),    # w1 (taps stacked)
                pl.BlockSpec((c_out, 1), lambda i: (0, 0)),           # bn1 bias
                pl.BlockSpec((3 * c_out, c_out), lambda i: (0, 0)),   # w2 (taps stacked)
                pl.BlockSpec((c_out, 1), lambda i: (0, 0)),           # bn2 bias
            ],
            out_specs=pl.BlockSpec((c_out, cols), lambda i: (0, i)),
        ),
        compiler_params=pltpu.CompilerParams(
            dimension_semantics=("parallel",),
            vmem_limit_bytes=vmem_limit),
    )(x_slab, w1s, b1, w2s, b2)

    return jnp.transpose(out_slab.reshape(c_out, n, length), (1, 0, 2))


def _reference(x, w1, g1, be1, m1, v1, w2, g2, be2, m2, v2, eps=1e-5):
    """Pure-JAX reference (NCL layout, like PyTorch)."""
    def conv(h, w):
        return lax.conv_general_dilated(
            h, w, window_strides=(1,), padding=[(1, 1)],
            dimension_numbers=("NCH", "OIH", "NCH"))

    def bn(h, g, b, m, v):
        s = g / jnp.sqrt(v + eps)
        return h * s[None, :, None] + (b - m * s)[None, :, None]

    out = jnp.maximum(bn(conv(x, w1), g1, be1, m1, v1), 0.0)
    out = bn(conv(out, w2), g2, be2, m2, v2)
    return jnp.maximum(out + x, 0.0)


if __name__ == "__main__":
    key = jax.random.PRNGKey(0)
    N, C, L = 4, 8, 64          # inplanes = planes = 8, stride = 1
    ks = jax.random.split(key, 11)

    x = jax.random.normal(ks[0], (N, C, L), dtype=jnp.float32)

    # Conv1d weights in PyTorch layout (Cout, Cin, K=3), bias=False.
    w1 = 0.1 * jax.random.normal(ks[1], (C, C, 3), dtype=jnp.float32)
    w2 = 0.1 * jax.random.normal(ks[2], (C, C, 3), dtype=jnp.float32)

    # BatchNorm1d (inference mode) parameters.
    g1 = 1.0 + 0.1 * jax.random.normal(ks[3], (C,), dtype=jnp.float32)
    be1 = 0.1 * jax.random.normal(ks[4], (C,), dtype=jnp.float32)
    m1 = 0.1 * jax.random.normal(ks[5], (C,), dtype=jnp.float32)
    v1 = jnp.abs(jax.random.normal(ks[6], (C,), dtype=jnp.float32)) + 0.5
    g2 = 1.0 + 0.1 * jax.random.normal(ks[7], (C,), dtype=jnp.float32)
    be2 = 0.1 * jax.random.normal(ks[8], (C,), dtype=jnp.float32)
    m2 = 0.1 * jax.random.normal(ks[9], (C,), dtype=jnp.float32)
    v2 = jnp.abs(jax.random.normal(ks[10], (C,), dtype=jnp.float32)) + 0.5

    # batch_tile=2 -> 2 samples per grid step, lane dim = 128 (exercises a
    # multi-step, megacore-parallel grid with 128-aligned lane blocks).
    out = basic_block_1d(x, w1, (g1, be1, m1, v1), w2, (g2, be2, m2, v2),
                         batch_tile=2)
    out = jax.block_until_ready(out)

    ref = _reference(x, w1, g1, be1, m1, v1, w2, g2, be2, m2, v2)
    assert out.shape == (N, C, L)
    max_err = float(jnp.max(jnp.abs(out - ref)))
    assert jnp.allclose(out, ref, atol=1e-4, rtol=1e-4), f"mismatch: {max_err}"

    print("KERNEL_OK")
</pallas_src>

<mosaic_0001>
module attributes {stable_mosaic.version = 11 : i64} {
  func.func @_basic_block_kernel(%arg0: i32, %arg1: memref<8x128xf32, #tpu.memory_space<vmem>>, %arg2: memref<24x8xf32, #tpu.memory_space<vmem>>, %arg3: memref<8x1xf32, #tpu.memory_space<vmem>>, %arg4: memref<24x8xf32, #tpu.memory_space<vmem>>, %arg5: memref<8x1xf32, #tpu.memory_space<vmem>>, %arg6: memref<8x128xf32, #tpu.memory_space<vmem>>) attributes {dimension_semantics = [#tpu.dimension_semantics<parallel>], iteration_bounds = array<i64: 2>, scalar_prefetch = 0 : i64, scratch_operands = 0 : i64, tpu.core_type = #tpu.core_type<tc>, window_params = [{transform_indices = @transform_0, window_bounds = array<i64: 8, 128>}, {pipeline_mode = #tpu.pipeline_mode<synchronous>, transform_indices = @transform_1, window_bounds = array<i64: 24, 8>}, {pipeline_mode = #tpu.pipeline_mode<synchronous>, transform_indices = @transform_2, window_bounds = array<i64: 8, 1>}, {pipeline_mode = #tpu.pipeline_mode<synchronous>, transform_indices = @transform_3, window_bounds = array<i64: 24, 8>}, {pipeline_mode = #tpu.pipeline_mode<synchronous>, transform_indices = @transform_4, window_bounds = array<i64: 8, 1>}, {transform_indices = @transform_5, window_bounds = array<i64: 8, 128>}]} {
    %c0 = arith.constant 0 : index
    %c0_0 = arith.constant 0 : index
    %0 = vector.load %arg1[%c0, %c0_0] : memref<8x128xf32, #tpu.memory_space<vmem>>, vector<8x128xf32>
    %1 = tpu.iota {dimensions = array<i32: 1>} : vector<8x128xi32>
    %c64_i32 = arith.constant 64 : i32
    %c0_i32 = arith.constant 0 : i32
    %2 = arith.cmpi eq, %c64_i32, %c0_i32 : i32
    %c1_i32 = arith.constant 1 : i32
    %3 = arith.select %2, %c1_i32, %c64_i32 : i32
    %4 = vector.broadcast %3 : i32 to vector<8x128xi32>
    %5 = arith.remsi %1, %4 : vector<8x128xi32>
    %c0_i32_1 = arith.constant 0 : i32
    %6 = vector.broadcast %c0_i32_1 : i32 to vector<8x128xi32>
    %7 = arith.cmpi ne, %5, %6 : vector<8x128xi32>
    %c0_i32_2 = arith.constant 0 : i32
    %8 = vector.broadcast %c0_i32_2 : i32 to vector<8x128xi32>
    %9 = arith.cmpi slt, %5, %8 : vector<8x128xi32>
    %c0_i32_3 = arith.constant 0 : i32
    %10 = arith.cmpi slt, %3, %c0_i32_3 : i32
    %11 = vector.broadcast %10 : i1 to vector<8x128xi1>
    %12 = vector.broadcast %11 : vector<8x128xi1> to vector<8x128xi1>
    %13 = arith.xori %9, %12 : vector<8x128xi1>
    %14 = arith.andi %13, %7 : vector<8x128xi1>
    %15 = vector.broadcast %3 : i32 to vector<8x128xi32>
    %16 = arith.addi %5, %15 : vector<8x128xi32>
    %17 = arith.select %14, %16, %5 : vector<8x128xi1>, vector<8x128xi32>
    %c0_i32_4 = arith.constant 0 : i32
    %18 = vector.broadcast %c0_i32_4 : i32 to vector<8x128xi32>
    %19 = arith.cmpi eq, %17, %18 : vector<8x128xi32>
    %c63_i32 = arith.constant 63 : i32
    %20 = vector.broadcast %c63_i32 : i32 to vector<8x128xi32>
    %21 = arith.cmpi eq, %17, %20 : vector<8x128xi32>
    %c0_5 = arith.constant 0 : index
    %c0_6 = arith.constant 0 : index
    %22 = vector.load %arg2[%c0_5, %c0_6] : memref<24x8xf32, #tpu.memory_space<vmem>>, vector<24x8xf32>
    %cst = arith.constant dense<0.000000e+00> : vector<24x128xf32>
    %23 = tpu.matmul %22, %0, %cst {dimension_numbers = #tpu.dot_dimension_numbers<[1], [0], [0], [1], [0, 0, 1, 1], [], []>} : vector<24x8xf32>, vector<8x128xf32>, vector<24x128xf32> -> vector<24x128xf32>
    %24 = vector.extract_strided_slice %23 {offsets = [0, 0], sizes = [8, 128], strides = [1, 1]} : vector<24x128xf32> to vector<8x128xf32>
    %25 = vector.extract_strided_slice %23 {offsets = [8, 0], sizes = [8, 128], strides = [1, 1]} : vector<24x128xf32> to vector<8x128xf32>
    %26 = vector.extract_strided_slice %23 {offsets = [16, 0], sizes = [8, 128], strides = [1, 1]} : vector<24x128xf32> to vector<8x128xf32>
    %c1_i32_7 = arith.constant 1 : i32
    %27 = tpu.dynamic_rotate %24 by %c1_i32_7 dim 1 : vector<8x128xf32>, i32 -> vector<8x128xf32>
    %cst_8 = arith.constant 0.000000e+00 : f32
    %28 = vector.broadcast %cst_8 : f32 to vector<8x128xf32>
    %29 = arith.select %19, %28, %27 : vector<8x128xi1>, vector<8x128xf32>
    %c127_i32 = arith.constant 127 : i32
    %30 = tpu.dynamic_rotate %26 by %c127_i32 dim 1 : vector<8x128xf32>, i32 -> vector<8x128xf32>
    %cst_9 = arith.constant 0.000000e+00 : f32
    %31 = vector.broadcast %cst_9 : f32 to vector<8x128xf32>
    %32 = arith.select %21, %31, %30 : vector<8x128xi1>, vector<8x128xf32>
    %33 = arith.addf %29, %25 : vector<8x128xf32>
    %34 = arith.addf %33, %32 : vector<8x128xf32>
    %c0_10 = arith.constant 0 : index
    %c0_11 = arith.constant 0 : index
    %35 = vector.load %arg3[%c0_10, %c0_11] : memref<8x1xf32, #tpu.memory_space<vmem>>, vector<8x1xf32>
    %36 = vector.broadcast %35 : vector<8x1xf32> to vector<8x128xf32>
    %37 = arith.addf %34, %36 : vector<8x128xf32>
    %cst_12 = arith.constant 0.000000e+00 : f32
    %38 = vector.broadcast %cst_12 : f32 to vector<8x128xf32>
    %39 = arith.maximumf %37, %38 : vector<8x128xf32>
    %c0_13 = arith.constant 0 : index
    %c0_14 = arith.constant 0 : index
    %40 = vector.load %arg4[%c0_13, %c0_14] : memref<24x8xf32, #tpu.memory_space<vmem>>, vector<24x8xf32>
    %cst_15 = arith.constant dense<0.000000e+00> : vector<24x128xf32>
    %41 = tpu.matmul %40, %39, %cst_15 {dimension_numbers = #tpu.dot_dimension_numbers<[1], [0], [0], [1], [0, 0, 1, 1], [], []>} : vector<24x8xf32>, vector<8x128xf32>, vector<24x128xf32> -> vector<24x128xf32>
    %42 = vector.extract_strided_slice %41 {offsets = [0, 0], sizes = [8, 128], strides = [1, 1]} : vector<24x128xf32> to vector<8x128xf32>
    %43 = vector.extract_strided_slice %41 {offsets = [8, 0], sizes = [8, 128], strides = [1, 1]} : vector<24x128xf32> to vector<8x128xf32>
    %44 = vector.extract_strided_slice %41 {offsets = [16, 0], sizes = [8, 128], strides = [1, 1]} : vector<24x128xf32> to vector<8x128xf32>
    %c1_i32_16 = arith.constant 1 : i32
    %45 = tpu.dynamic_rotate %42 by %c1_i32_16 dim 1 : vector<8x128xf32>, i32 -> vector<8x128xf32>
    %cst_17 = arith.constant 0.000000e+00 : f32
    %46 = vector.broadcast %cst_17 : f32 to vector<8x128xf32>
    %47 = arith.select %19, %46, %45 : vector<8x128xi1>, vector<8x128xf32>
    %c127_i32_18 = arith.constant 127 : i32
    %48 = tpu.dynamic_rotate %44 by %c127_i32_18 dim 1 : vector<8x128xf32>, i32 -> vector<8x128xf32>
    %cst_19 = arith.constant 0.000000e+00 : f32
    %49 = vector.broadcast %cst_19 : f32 to vector<8x128xf32>
    %50 = arith.select %21, %49, %48 : vector<8x128xi1>, vector<8x128xf32>
    %51 = arith.addf %47, %43 : vector<8x128xf32>
    %52 = arith.addf %51, %50 : vector<8x128xf32>
    %c0_20 = arith.constant 0 : index
    %c0_21 = arith.constant 0 : index
    %53 = vector.load %arg5[%c0_20, %c0_21] : memref<8x1xf32, #tpu.memory_space<vmem>>, vector<8x1xf32>
    %54 = vector.broadcast %53 : vector<8x1xf32> to vector<8x128xf32>
    %55 = arith.addf %52, %54 : vector<8x128xf32>
    %56 = arith.addf %55, %0 : vector<8x128xf32>
    %cst_22 = arith.constant 0.000000e+00 : f32
    %57 = vector.broadcast %cst_22 : f32 to vector<8x128xf32>
    %58 = arith.maximumf %56, %57 : vector<8x128xf32>
    %c0_23 = arith.constant 0 : index
    %c0_24 = arith.constant 0 : index
    %59 = vector.load %arg6[%c0_23, %c0_24] : memref<8x128xf32, #tpu.memory_space<vmem>>, vector<8x128xf32>
    tpu.vector_store %arg6[%c0_23, %c0_24], %58 {strides = array<i32>} : memref<8x128xf32, #tpu.memory_space<vmem>>, vector<8x128xf32>,
    return
  }
  func.func @transform_0(%arg0: i32) -> (i32, i32) {
    %c0_i32 = arith.constant 0 : i32
    %c0_i32_0 = arith.constant 0 : i32
    return %c0_i32, %arg0 : i32, i32
  }
  func.func @transform_1(%arg0: i32) -> (i32, i32) {
    %c0_i32 = arith.constant 0 : i32
    %c0_i32_0 = arith.constant 0 : i32
    %c0_i32_1 = arith.constant 0 : i32
    return %c0_i32, %c0_i32_0 : i32, i32
  }
  func.func @transform_2(%arg0: i32) -> (i32, i32) {
    %c0_i32 = arith.constant 0 : i32
    %c0_i32_0 = arith.constant 0 : i32
    %c0_i32_1 = arith.constant 0 : i32
    return %c0_i32, %c0_i32_0 : i32, i32
  }
  func.func @transform_3(%arg0: i32) -> (i32, i32) {
    %c0_i32 = arith.constant 0 : i32
    %c0_i32_0 = arith.constant 0 : i32
    %c0_i32_1 = arith.constant 0 : i32
    return %c0_i32, %c0_i32_0 : i32, i32
  }
  func.func @transform_4(%arg0: i32) -> (i32, i32) {
    %c0_i32 = arith.constant 0 : i32
    %c0_i32_0 = arith.constant 0 : i32
    %c0_i32_1 = arith.constant 0 : i32
    return %c0_i32, %c0_i32_0 : i32, i32
  }
  func.func @transform_5(%arg0: i32) -> (i32, i32) {
    %c0_i32 = arith.constant 0 : i32
    %c0_i32_0 = arith.constant 0 : i32
    return %c0_i32, %arg0 : i32, i32
  }
}

</mosaic_0001>

<bundles_post_ra>
// kernel: tpu_custom_call.1
= control target key start
LH: loop header
LB: loop body
LE: loop exit
PB: predicated region body
PF: predicated region fallthrough
CT: control target
= control target key end

     0   :  { %10 = vsyncpa [#allocation3], 0  ;;  %s881_s0 = inlined_call_operand.vmem [shape: f32[8,256], index: 0, kind: input, shape index: {}]   ;;  %s882_s1 = inlined_call_operand.vmem [shape: f32[24,8], index: 1, kind: input, shape index: {}]   ;;  %s883_s2 = inlined_call_operand.vmem [shape: f32[8,1], index: 2, kind: input, shape index: {}]   ;;  %s884_s3 = inlined_call_operand.vmem [shape: f32[24,8], index: 3, kind: input, shape index: {}]   ;;  %s885_s4 = inlined_call_operand.vmem [shape: f32[8,1], index: 4, kind: input, shape index: {}]   ;;  %s886_s5 = inlined_call_operand.hbm [shape: f32[8,256], index: 5, kind: output, shape index: {}]  }
   0x1   :  { %12 = vsyncpa [#allocation3 + $0x1], 0  ;;  %s721_s18 = smov 0   ;;  %s723_s19 = smov 0  }
   0x2   :  { %s725_s20 = smov 0   ;;  %s727_s21 = smov 0  }
   0x3 LB: > { %s742_s22 = sadd.s32 4294967295, %s683_s21   ;;  %s529_s23 = sadd.s32 4294967294, %s683_s21   ;;  %s683_s21 = sphi %s727_s21, %s896_s21   ;;  %s679_s20 = sphi %s725_s20, %s895_s20   ;;  %s675_s19 = sphi %s723_s19, %s894_s19   ;;  %s671_s18 = sphi %s721_s18, %s893_s18  }
   0x4   : > { %s746_s24 = sadd.s32 1, %s683_s21   ;;  %s135_s25 = sadd.s32 1, %s679_s20 }
   0x5   : > { %s132_s26 = ssub.s32 %s683_s21, %s746_s24  ;;  %p145_p0 = scmp.ne.s32.totalorder %s679_s20, %s675_s19 }
   0x6   : > { %p133_p1 = scmp.eq.s32.totalorder %s132_s26, 0  ;;  %p146_p2 = scmp.eq.s32.totalorder %s742_s22, 1 }
   0x7   : > { %p151_p3 = scmp.ne.s32.totalorder %s675_s19, %s671_s18  ;;  %p152_p4 = scmp.eq.s32.totalorder %s529_s23, 1 }
   0x8   : > { %s757_s27 = scalar_select %p133_p1, %s679_s20, %s135_s25  }
   0x9   : > { %p759_p5 = por %p146_p2, %p145_p0  ;;  %p763_p6 = por %p152_p4, %p151_p3 }
   0xa   : > { %p532_p7 = scmp.ge.s32.totalorder %s683_s21, 1  ;;  %p189_p8 = scmp.lt.s32.totalorder %s683_s21, 3 }
   0xc   : > { %p190_p9 = pnand %p532_p7, %p189_p8 }
   0xd   : > { %p216_p10 = scmp.lt.s32.totalorder (!%p190_p9), %s742_s22, 1  ;;  %v685_v0 = vmov (!%p190_p9), 0.0   ;;  %vm686_vm0 = vmmov (!%p190_p9), 0   ;;  %v338_v1 = vld [vmem:[%s883_s2] sm:$0xff] (!%p190_p9)  ;;  %v687_v2 = vmov (!%p190_p9), 0   ;;  %vm240_vm1 = vcmask (!%p190_p9), 64512  }
   0xe   : > { %193 = sbr.rel (%p190_p9) target bundleno = 728 (0x2d8), region = 40  ;;  %553 = vmatprep.subr.mxu0 (!%p190_p9), %v685_v0  ;;  %555 = vmatprep.mubr.msk.f32.mxu0 (!%p190_p9), %vm686_vm0, %v685_v0  ;;  %v237_v3 = vld [vmem:[%s882_s1] sm:$0xff] (!%p190_p9)  ;;  %v238_v5 = vld [vmem:[%s882_s1 + $0x8] sm:$0xff] (!%p190_p9)  ;;  %v239_v6 = vld [vmem:[%s882_s1 + $0x10] sm:$0xff] (!%p190_p9)  ;;  %s688_s23 = smov (!%p190_p9), 1   ;;  %v221_v14 = vlaneseq (!%p190_p9) }
   0xf   : > { %619 = vset.pattern.permute.xlu0 (!%p190_p9), %v687_v2  ;;  %564 = vmatprep.subr.mxu1 (!%p190_p9), %v685_v0  ;;  %s689_s25 = smov (!%p190_p9), 127   ;;  %v446_v13 = vld [vmem:[%s885_s4] sm:$0xff] (!%p190_p9)  ;;  %v347_v29 = vld [vmem:[%s884_s3 + $0x8] sm:$0xff] (!%p190_p9)  ;;  %v348_v30 = vld [vmem:[%s884_s3 + $0x10] sm:$0xff] (!%p190_p9)  ;;  %s213_s12 = sand.u32 (!%p190_p9), 1, %s675_s19  }
  0x10   : > { %341 = vperm.xlu0 (!%p190_p9), %619, %v338_v1   ;;  %566 = vmatprep.mubr.msk.f32.mxu1 (!%p190_p9), %vm686_vm0, %v685_v0  ;;  %v222_v15 = vand.u32 (!%p190_p9), 127, %v221_v14  ;;  %v346_v28 = vld [vmem:[%s884_s3] sm:$0xff] (!%p190_p9)  ;;  %s533_s13 = sshll.u32 (!%p190_p9), %s213_s12, 3  ;;  %s542_s14 = sshll.u32 (!%p190_p9), %s742_s22, 7 }
  0x11   : > { %620 = vset.pattern.permute.xlu1 (!%p190_p9), %v687_v2  ;;  %s215_s15 = scalar_lea.vmem (!%p190_p9), [#allocation2], %s533_s13  ;;  %s457_s26 = scalar_lea.sflag (!%p190_p9), [#allocation3], %s213_s12 }
  0x12   : > { %v227_v17 = vand.u32 (!%p190_p9), 63, %v222_v15  ;;  %s470_s16 = sshll.u32 (!%p190_p9), %s215_s15, 4  ;;  %s841_s16 = int_to_ptr.vmem [resolvable:$true] %s470_s16 }
  0x13   : > { %s621_s30 = scalar_lea.vmem (!%p190_p9), %s841_s16, 128 }
  0x14   : > { %vm801_vm2 = vcmp.eq.s32.totalorder (!%p190_p9), %v227_v17, 0  ;;  %vm807_vm3 = vcmp.eq.s32.totalorder (!%p190_p9), %v227_v17, 63  ;;  %p622_p11 = scmp.ne.s32.totalorder (!%p190_p9), %s841_s16, %s621_s30 }
  0x15   : > { %s217_s7 = scalar_select %p216_p10, %s742_s22, 1 }
  0x16   : > { %p623_p12 = pnand %p622_p11, %p759_p5  ;;  %s690_s22 = smov [#allocation2]  }
  0x17   : > { %s534_s8 = sshll.u32 %s217_s7, 3  ;;  %s625_s6 = sshll.u32 %s690_s22, 4  ;;  %s626_s6 = int_to_ptr.vmem [resolvable:$false] %s625_s6 }
  0x18   : > { %s219_s11 = scalar_lea.vmem %s881_s0, %s534_s8  ;;  %p624_p13 = pneg %p623_p12 }
  0x19   : > { %v782_v4 = vld [vmem:[%s219_s11] sm:$0xff]  ;;  %s627_s7 = scalar_lea.vmem %s626_s6, 256  ;;  %p628_p0 = scmp.lt.s32.totalorder %s841_s16, %s626_s6 }
  0x1a   : > { %554 = vmatpush3.msra.mxu0 %v782_v4  ;;  %p629_p1 = scmp.lt.s32.totalorder %s627_s7, %s621_s30 }
  0x1b   : > { %556 = vmatmul.mubr.msk.f32.vlgmr.msra.gmra.mrb[0].mxu0 %vm240_vm1, %v237_v3 }
  0x1c   : > { %558 = vmatprep.mubr.msk.f32.mxu0 %vm686_vm0, %v685_v0  ;;  %p630_p2 = por %p629_p1, %p628_p0 }
  0x1e   : > { %p631_p3 = pnand %p630_p2, %p624_p13 }
  0x1f   : > { %559 = vmatmul.mubr.msk.f32.gmra.mrb[2].mxu0 %vm240_vm1, %v238_v5 }
  0x20   : > { %561 = vmatprep.mubr.msk.f32.mxu0 %vm686_vm0, %v685_v0 }
  0x23   : > { %562 = vmatmul.mubr.msk.f32.gmra.mrb[4].mxu0 %vm240_vm1, %v239_v6 }
  0x8f   : > { %v342_v16 = vpop.permute.xlu0 %341 }
  0xee   : > { %v316_v7 = vpop.f32.mrb[0].mxu0 }
  0xef   : > { %330 = vrot.lane.b32.xlu0 %v316_v7, %s688_s23  ;;  %v557_v8 = vpop.f32.mrb[1].mxu0 }
  0xf2   : > { %v321_v9 = vpop.f32.mrb[2].mxu0 }
  0xf3   : > { %v560_v10 = vpop.f32.mrb[3].mxu0 }
  0xf6   : > { %v326_v11 = vpop.f32.mrb[4].mxu0 }
  0xf7   : > { %333 = vrot.lane.b32.xlu1 %v326_v11, %s689_s25  ;;  %v563_v12 = vpop.f32.mrb[5].mxu0 }
  0xfb   : > { %449 = vperm.xlu1 %620, %v446_v13  }
 0x161   : > { %v331_v19 = vpop.permute.xlu0 %330 }
 0x162   : > { %v332_v20 = vsel %vm801_vm2, 0.0, %v331_v19 }
 0x163   : > { %v336_v22 = vadd.f32 %v332_v20, %v321_v9 }
 0x169   : > { %v334_v23 = vpop.permute.xlu1 %333 }
 0x16a   : > { %v335_v24 = vsel %vm807_vm3, 0.0, %v334_v23 }
 0x16b   : > { %v337_v25 = vadd.f32 %v336_v22, %v335_v24 }
 0x16d   : > { %v344_v26 = vadd.f32 %v342_v16, %v337_v25 }
 0x16f   : > { %v345_v27 = vmax.f32 %v344_v26, 0.0 }
 0x171   : > { %565 = vmatpush3.msra.mxu1 %v345_v27 }
 0x172   : > { %567 = vmatmul.mubr.msk.f32.vlgmr.msra.gmra.mrb[0].mxu1 %vm240_vm1, %v346_v28 }
 0x173   : > { %569 = vmatprep.mubr.msk.f32.mxu1 %vm686_vm0, %v685_v0 }
 0x176   : > { %570 = vmatmul.mubr.msk.f32.gmra.mrb[2].mxu1 %vm240_vm1, %v347_v29 }
 0x177   : > { %572 = vmatprep.mubr.msk.f32.mxu1 %vm686_vm0, %v685_v0 }
 0x17a   : > { %573 = vmatmul.mubr.msk.f32.gmra.mrb[4].mxu1 %vm240_vm1, %v348_v30  ;;  %v450_v38 = vpop.permute.xlu1 %449 }
 0x245   : > { %v424_v31 = vpop.f32.mrb[0].mxu1 }
 0x246   : > { %438 = vrot.lane.b32.xlu0 %v424_v31, %s688_s23  ;;  %v568_v32 = vpop.f32.mrb[1].mxu1 }
 0x249   : > { %v429_v33 = vpop.f32.mrb[2].mxu1 }
 0x24a   : > { %v571_v34 = vpop.f32.mrb[3].mxu1 }
 0x24d   : > { %v434_v35 = vpop.f32.mrb[4].mxu1 }
 0x24e   : > { %441 = vrot.lane.b32.xlu1 %v434_v35, %s689_s25  ;;  %v574_v36 = vpop.f32.mrb[5].mxu1  ;;  %s839_s25 = scalar_lea.hbm %s886_s5, %s542_s14 }
 0x2b8   : > { %v439_v37 = vpop.permute.xlu0 %438 }
 0x2b9   : > { %v440_v39 = vsel %vm801_vm2, 0.0, %v439_v37 }
 0x2ba   : > { %v444_v40 = vadd.f32 %v440_v39, %v429_v33 }
 0x2c0   : > { %v442_v41 = vpop.permute.xlu1 %441 }
 0x2c1   : > { %v443_v42 = vsel %vm807_vm3, 0.0, %v442_v41 }
 0x2c2   : > { %v445_v43 = vadd.f32 %v444_v40, %v443_v42 }
 0x2c4   : > { %v452_v44 = vadd.f32 %v450_v38, %v445_v43 }
 0x2c6   : > { %v453_v45 = vadd.f32 %v452_v44, %v782_v4 }
 0x2c8   : > { %v454_v46 = vmax.f32 %v453_v45, 0.0 }
 0x2ca   : > { %455 = vst [vmem:[%s215_s15] sm:$0xff] %v454_v46 }
 0x2cb   : > { %634 = shalt.err (!%p631_p3)
}
 0x2cc   : > { %s635_s8 = scalar_lea.hbm %s839_s25, 128  ;;  %s639_s11 = scalar_lea.hbm %s886_s5, 256 }
 0x2cd   : > { %p636_p4 = scmp.ne.s32.totalorder %s839_s25, %s635_s8  ;;  %p640_p9 = scmp.lt.u32.totalorder %s839_s25, %s886_s5 }
 0x2ce   : > { %p641_p10 = scmp.lt.u32.totalorder %s639_s11, %s635_s8  ;;  %p643_p12 = scmp.lt.u32.totalorder %s635_s8, %s839_s25 }
 0x2cf   : > { %p637_p7 = pnand %p636_p4, %p759_p5 }
 0x2d0   : > { %p642_p11 = por %p641_p10, %p640_p9 }
 0x2d1   : > { %p638_p8 = pneg %p637_p7 }
 0x2d2   : > { %p644_p13 = por %p643_p12, %p642_p11 }
 0x2d4   : > { %p645_p0 = pnand %p644_p13, %p638_p8 }
 0x2d6   : > { %648 = shalt.err (!%p645_p0)
}
 0x2d7   : > { %575 = dma.vmem_to_hbm [thread:$0]  (%p759_p5), %s841_s16, 128, %s839_s25, %s457_s26  }
 0x2d8 PF: > { %p581_p1 = scmp.ge.s32.totalorder %s683_s21, 2  ;;  %s482_s14 = sand.u32 1, %s671_s18  }
 0x2d9   : > { %s483_s15 = scalar_lea.sflag [#allocation3], %s482_s14 }
 0x2da   : > { %p578_p2 = pnand %p581_p1, %p763_p6 }
 0x2dc   : > { %666 = dma.done.wait (!%p578_p2), %s483_s15, 128  }
 0x2dd   : > { %668 = vsyncadd (!%p578_p2), %s483_s15, 4294967168  ;;  %p15_p3 = scmp.ge.s32.totalorder %s746_s24, 4   ;;  %s893_s18 = smov %s675_s19 }
 0x2de   : > { %s894_s19 = smov %s679_s20  ;;  %s895_s20 = smov %s757_s27 }
 0x2df   : > { %s896_s21 = smov %s746_s24  ;;  %17 = sbr.rel (!%p15_p3) target bundleno = 3 (0x3), region = 75 }
 0x2e6   :  { %488 = vsyncpa [#allocation3], 1 }
 0x2e7   :  { %490 = vsyncpa [#allocation3 + $0x1], 1 }

</bundles_post_ra>
